<compile_context>
chip_gen: v5e
topology: v5e:2x2
jax: 0.10.0
libtpu: 0.0.40
codegen_flags: <defaults>
</compile_context>

<pallas_src>
import jax
import jax.numpy as jnp
from jax.experimental import pallas as pl
from jax.experimental.pallas import tpu as pltpu

TB = 8  # ids gathered per grid step (sublane-aligned output block)


def _gather_rows_kernel(ids_ref, table_hbm, out_ref, row_buf, copy_sems):
    """One grid step: DMA TB table rows (HBM -> VMEM) selected by SMEM ids.

    ids_ref:   SMEM (Np,)  int32 -- scalar-prefetched row indices
    table_hbm: HBM  (V, D)       -- embedding table, never fully resident
    out_ref:   VMEM (TB, D)      -- gathered embeddings for this block
    row_buf:   VMEM (TB, D)      -- DMA staging buffer (scratch)
    copy_sems: DMA sems (TB,)    -- one per in-flight row copy
    """
    base = pl.program_id(0) * TB
    copies = []
    for k in range(TB):  # static unroll: TB independent row DMAs in flight
        cp = pltpu.make_async_copy(
            table_hbm.at[ids_ref[base + k]], row_buf.at[k], copy_sems.at[k])
        cp.start()
        copies.append(cp)
    for cp in copies:
        cp.wait()
    out_ref[...] = row_buf[...]


def embedding_lookup(ids, table):
    """Pallas row gather: out[n, :] = table[ids[n], :] (ids clipped to range)."""
    ids = jnp.asarray(ids).reshape(-1).astype(jnp.int32)
    (N,) = ids.shape
    V, D = table.shape
    ids = jnp.clip(ids, 0, V - 1)          # manual DMA must never read OOB
    pad = (-N) % TB
    if pad:
        ids = jnp.pad(ids, (0, pad))       # padded ids gather row 0, sliced off
    Np = ids.shape[0]

    out = pl.pallas_call(
        _gather_rows_kernel,
        out_shape=jax.ShapeDtypeStruct((Np, D), table.dtype),
        grid_spec=pltpu.PrefetchScalarGridSpec(
            num_scalar_prefetch=1,             # ids -> SMEM, no VMEM id block
            grid=(Np // TB,),
            in_specs=[pl.BlockSpec(memory_space=pl.ANY)],   # table stays in HBM
            out_specs=pl.BlockSpec((TB, D), lambda i, ids_ref: (i, 0)),
            scratch_shapes=[
                pltpu.VMEM((TB, D), table.dtype),
                pltpu.SemaphoreType.DMA((TB,)),
            ],
        ),
        compiler_params=pltpu.CompilerParams(
            # Grid steps are independent; "arbitrary" kept for safety with the
            # shared DMA-semaphore scratch (megacore gain is zero at these N).
            dimension_semantics=("arbitrary",),
        ),
    )(ids, table)
    return out[:N]


def multi_embedding_lookup(id_list, table):
    """Fuse several id vectors into one pallas_call; split results back out."""
    sizes = [int(ids.shape[0]) for ids in id_list]
    all_ids = jnp.concatenate([jnp.asarray(i).reshape(-1) for i in id_list])
    flat = embedding_lookup(all_ids, table)
    outs, off = [], 0
    for n in sizes:
        outs.append(flat[off:off + n])
        off += n
    return outs


class UserItemEmbeds:
    """Synthetic stand-in for the injected `useritem_embeds` submodule.

    User and item tables are stored as one combined [num_users+num_items, D]
    table (built once at init) so user+item lookups can share a single launch.
    """

    def __init__(self, user_table, item_table):
        assert user_table.shape[1] == item_table.shape[1]
        assert user_table.dtype == item_table.dtype
        self.num_users = int(user_table.shape[0])
        self.num_items = int(item_table.shape[0])
        self.embed_dim = int(user_table.shape[1])
        self.table = jnp.concatenate([user_table, item_table], axis=0)

    def _to_rows(self, index_tensors, is_user):
        offset = 0 if is_user else self.num_users
        limit = self.num_users if is_user else self.num_items
        return [
            jnp.clip(jnp.asarray(t).reshape(-1).astype(jnp.int32), 0, limit - 1) + offset
            for t in index_tensors
        ]

    def __call__(self, *index_tensors, is_user=True, with_neighbor=False):
        # TODO(synk): `with_neighbor` graph aggregation is undefined in the
        # reference module (user_graph/item_graph default False); plain lookup.
        rows = self._to_rows(index_tensors, is_user)
        outs = multi_embedding_lookup(rows, self.table)
        return [o.reshape(tuple(t.shape) + (self.embed_dim,))
                for o, t in zip(outs, index_tensors)]

    def lookup_fused(self, user_tensors, item_tensors):
        """Single pallas_call covering every user and item index tensor."""
        rows = self._to_rows(user_tensors, True) + self._to_rows(item_tensors, False)
        tensors = list(user_tensors) + list(item_tensors)
        outs = multi_embedding_lookup(rows, self.table)
        outs = [o.reshape(tuple(t.shape) + (self.embed_dim,))
                for o, t in zip(outs, tensors)]
        return outs[:len(user_tensors)], outs[len(user_tensors):]


class Recommender:
    def __init__(self, useritem_embeds, user_graph=False, item_graph=False):
        self.useritem_embeds = useritem_embeds
        self.user_graph = user_graph
        self.item_graph = item_graph

    def forward(self, query_users, query_items, with_attr=False):
        # Mirror torch semantics: squeeze(0) if the first tensor has dim > 1.
        if query_users[0].ndim > 1:
            query_users = [jnp.squeeze(x, axis=0) for x in query_users]
        if query_items[0].ndim > 1:
            query_items = [jnp.squeeze(x, axis=0) for x in query_items]
        if not with_attr:
            if not (self.user_graph or self.item_graph):
                # Fast path: all lookups of this forward in a single launch.
                query_users, query_items = self.useritem_embeds.lookup_fused(
                    query_users, query_items)
            else:
                query_users = self.useritem_embeds(
                    *query_users, is_user=True, with_neighbor=self.user_graph)
                query_items = self.useritem_embeds(
                    *query_items, is_user=False, with_neighbor=self.item_graph)
        return query_users, query_items


if __name__ == "__main__":
    key = jax.random.PRNGKey(0)
    k_users, k_items, k_uid, k_iid = jax.random.split(key, 4)

    num_users, num_items, embed_dim = 64, 96, 128
    n_query = 8

    # Deterministic synthetic parameters (the module's __init__ injects the
    # embedding submodule; we build equivalent tables here).
    user_table = jax.random.normal(k_users, (num_users, embed_dim), jnp.float32)
    item_table = jax.random.normal(k_items, (num_items, embed_dim), jnp.float32)

    # Query index tensors with a leading singleton dim, as the module expects.
    query_user_ids = jax.random.randint(k_uid, (1, n_query), 0, num_users, jnp.int32)
    query_item_ids = jax.random.randint(k_iid, (1, n_query), 0, num_items, jnp.int32)

    model = Recommender(UserItemEmbeds(user_table, item_table))
    (user_embs,), (item_embs,) = model.forward([query_user_ids], [query_item_ids])
    jax.block_until_ready((user_embs, item_embs))

    # Reference check against plain JAX gather.
    ref_u = jnp.take(user_table, query_user_ids[0], axis=0)
    ref_i = jnp.take(item_table, query_item_ids[0], axis=0)
    assert user_embs.shape == (n_query, embed_dim)
    assert item_embs.shape == (n_query, embed_dim)
    assert jnp.allclose(user_embs, ref_u, atol=1e-6)
    assert jnp.allclose(item_embs, ref_i, atol=1e-6)

    print("KERNEL_OK")
</pallas_src>

<mosaic_0001>
module attributes {stable_mosaic.version = 11 : i64} {
  func.func @_gather_rows_kernel(%arg0: i32, %arg1: memref<16xi32, #tpu.memory_space<smem>>, %arg2: memref<160x128xf32, #tpu.memory_space<any>>, %arg3: memref<8x128xf32, #tpu.memory_space<vmem>>, %arg4: memref<8x128xf32, #tpu.memory_space<vmem>>, %arg5: memref<8x!tpu.dma_semaphore, #tpu.memory_space<semaphore_mem>>) attributes {dimension_semantics = [#tpu.dimension_semantics<arbitrary>], iteration_bounds = array<i64: 2>, scalar_prefetch = 1 : i64, scratch_operands = 2 : i64, tpu.core_type = #tpu.core_type<tc>, window_params = [{}, {transform_indices = @transform_1, window_bounds = array<i64: 8, 128>}]} {
    %c8_i32 = arith.constant 8 : i32
    %0 = arith.muli %arg0, %c8_i32 : i32
    %c0_i32 = arith.constant 0 : i32
    %1 = arith.addi %0, %c0_i32 : i32
    %2 = arith.index_cast %1 : i32 to index
    %3 = memref.load %arg1[%2] : memref<16xi32, #tpu.memory_space<smem>>
    %c0_i32_0 = arith.constant 0 : i32
    %c0_i32_1 = arith.constant 0 : i32
    %c0_i32_2 = arith.constant 0 : i32
    %4 = tpu.memref_slice %arg2[%3, %c0_i32_2] : memref<160x128xf32, #tpu.memory_space<any>> -> memref<1x128xf32, #tpu.memory_space<any>>
    %5 = tpu.memref_squeeze %4 : memref<1x128xf32, #tpu.memory_space<any>> -> memref<128xf32, #tpu.memory_space<any>>
    %c0_i32_3 = arith.constant 0 : i32
    %6 = tpu.memref_slice %arg4[%c0_i32_0, %c0_i32_3] : memref<8x128xf32, #tpu.memory_space<vmem>> -> memref<1x128xf32, #tpu.memory_space<vmem>>
    %7 = tpu.memref_squeeze %6 : memref<1x128xf32, #tpu.memory_space<vmem>> -> memref<128xf32, #tpu.memory_space<vmem>>
    %8 = tpu.memref_slice %arg5[%c0_i32_1] : memref<8x!tpu.dma_semaphore, #tpu.memory_space<semaphore_mem>> -> memref<1x!tpu.dma_semaphore, #tpu.memory_space<semaphore_mem>>
    %9 = tpu.memref_squeeze %8 : memref<1x!tpu.dma_semaphore, #tpu.memory_space<semaphore_mem>> -> memref<!tpu.dma_semaphore, #tpu.memory_space<semaphore_mem>>
    tpu.enqueue_dma source(%5 : memref<128xf32, #tpu.memory_space<any>>) target(%7 : memref<128xf32, #tpu.memory_space<vmem>>) target_semaphore(%9 : memref<!tpu.dma_semaphore, #tpu.memory_space<semaphore_mem>>)
    %c1_i32 = arith.constant 1 : i32
    %10 = arith.addi %0, %c1_i32 : i32
    %11 = arith.index_cast %10 : i32 to index
    %12 = memref.load %arg1[%11] : memref<16xi32, #tpu.memory_space<smem>>
    %c1_i32_4 = arith.constant 1 : i32
    %c1_i32_5 = arith.constant 1 : i32
    %c0_i32_6 = arith.constant 0 : i32
    %13 = tpu.memref_slice %arg2[%12, %c0_i32_6] : memref<160x128xf32, #tpu.memory_space<any>> -> memref<1x128xf32, #tpu.memory_space<any>>
    %14 = tpu.memref_squeeze %13 : memref<1x128xf32, #tpu.memory_space<any>> -> memref<128xf32, #tpu.memory_space<any>>
    %c0_i32_7 = arith.constant 0 : i32
    %15 = tpu.memref_slice %arg4[%c1_i32_4, %c0_i32_7] : memref<8x128xf32, #tpu.memory_space<vmem>> -> memref<1x128xf32, #tpu.memory_space<vmem>>
    %16 = tpu.memref_squeeze %15 : memref<1x128xf32, #tpu.memory_space<vmem>> -> memref<128xf32, #tpu.memory_space<vmem>>
    %17 = tpu.memref_slice %arg5[%c1_i32_5] : memref<8x!tpu.dma_semaphore, #tpu.memory_space<semaphore_mem>> -> memref<1x!tpu.dma_semaphore, #tpu.memory_space<semaphore_mem>>
    %18 = tpu.memref_squeeze %17 : memref<1x!tpu.dma_semaphore, #tpu.memory_space<semaphore_mem>> -> memref<!tpu.dma_semaphore, #tpu.memory_space<semaphore_mem>>
    tpu.enqueue_dma source(%14 : memref<128xf32, #tpu.memory_space<any>>) target(%16 : memref<128xf32, #tpu.memory_space<vmem>>) target_semaphore(%18 : memref<!tpu.dma_semaphore, #tpu.memory_space<semaphore_mem>>)
    %c2_i32 = arith.constant 2 : i32
    %19 = arith.addi %0, %c2_i32 : i32
    %20 = arith.index_cast %19 : i32 to index
    %21 = memref.load %arg1[%20] : memref<16xi32, #tpu.memory_space<smem>>
    %c2_i32_8 = arith.constant 2 : i32
    %c2_i32_9 = arith.constant 2 : i32
    %c0_i32_10 = arith.constant 0 : i32
    %22 = tpu.memref_slice %arg2[%21, %c0_i32_10] : memref<160x128xf32, #tpu.memory_space<any>> -> memref<1x128xf32, #tpu.memory_space<any>>
    %23 = tpu.memref_squeeze %22 : memref<1x128xf32, #tpu.memory_space<any>> -> memref<128xf32, #tpu.memory_space<any>>
    %c0_i32_11 = arith.constant 0 : i32
    %24 = tpu.memref_slice %arg4[%c2_i32_8, %c0_i32_11] : memref<8x128xf32, #tpu.memory_space<vmem>> -> memref<1x128xf32, #tpu.memory_space<vmem>>
    %25 = tpu.memref_squeeze %24 : memref<1x128xf32, #tpu.memory_space<vmem>> -> memref<128xf32, #tpu.memory_space<vmem>>
    %26 = tpu.memref_slice %arg5[%c2_i32_9] : memref<8x!tpu.dma_semaphore, #tpu.memory_space<semaphore_mem>> -> memref<1x!tpu.dma_semaphore, #tpu.memory_space<semaphore_mem>>
    %27 = tpu.memref_squeeze %26 : memref<1x!tpu.dma_semaphore, #tpu.memory_space<semaphore_mem>> -> memref<!tpu.dma_semaphore, #tpu.memory_space<semaphore_mem>>
    tpu.enqueue_dma source(%23 : memref<128xf32, #tpu.memory_space<any>>) target(%25 : memref<128xf32, #tpu.memory_space<vmem>>) target_semaphore(%27 : memref<!tpu.dma_semaphore, #tpu.memory_space<semaphore_mem>>)
    %c3_i32 = arith.constant 3 : i32
    %28 = arith.addi %0, %c3_i32 : i32
    %29 = arith.index_cast %28 : i32 to index
    %30 = memref.load %arg1[%29] : memref<16xi32, #tpu.memory_space<smem>>
    %c3_i32_12 = arith.constant 3 : i32
    %c3_i32_13 = arith.constant 3 : i32
    %c0_i32_14 = arith.constant 0 : i32
    %31 = tpu.memref_slice %arg2[%30, %c0_i32_14] : memref<160x128xf32, #tpu.memory_space<any>> -> memref<1x128xf32, #tpu.memory_space<any>>
    %32 = tpu.memref_squeeze %31 : memref<1x128xf32, #tpu.memory_space<any>> -> memref<128xf32, #tpu.memory_space<any>>
    %c0_i32_15 = arith.constant 0 : i32
    %33 = tpu.memref_slice %arg4[%c3_i32_12, %c0_i32_15] : memref<8x128xf32, #tpu.memory_space<vmem>> -> memref<1x128xf32, #tpu.memory_space<vmem>>
    %34 = tpu.memref_squeeze %33 : memref<1x128xf32, #tpu.memory_space<vmem>> -> memref<128xf32, #tpu.memory_space<vmem>>
    %35 = tpu.memref_slice %arg5[%c3_i32_13] : memref<8x!tpu.dma_semaphore, #tpu.memory_space<semaphore_mem>> -> memref<1x!tpu.dma_semaphore, #tpu.memory_space<semaphore_mem>>
    %36 = tpu.memref_squeeze %35 : memref<1x!tpu.dma_semaphore, #tpu.memory_space<semaphore_mem>> -> memref<!tpu.dma_semaphore, #tpu.memory_space<semaphore_mem>>
    tpu.enqueue_dma source(%32 : memref<128xf32, #tpu.memory_space<any>>) target(%34 : memref<128xf32, #tpu.memory_space<vmem>>) target_semaphore(%36 : memref<!tpu.dma_semaphore, #tpu.memory_space<semaphore_mem>>)
    %c4_i32 = arith.constant 4 : i32
    %37 = arith.addi %0, %c4_i32 : i32
    %38 = arith.index_cast %37 : i32 to index
    %39 = memref.load %arg1[%38] : memref<16xi32, #tpu.memory_space<smem>>
    %c4_i32_16 = arith.constant 4 : i32
    %c4_i32_17 = arith.constant 4 : i32
    %c0_i32_18 = arith.constant 0 : i32
    %40 = tpu.memref_slice %arg2[%39, %c0_i32_18] : memref<160x128xf32, #tpu.memory_space<any>> -> memref<1x128xf32, #tpu.memory_space<any>>
    %41 = tpu.memref_squeeze %40 : memref<1x128xf32, #tpu.memory_space<any>> -> memref<128xf32, #tpu.memory_space<any>>
    %c0_i32_19 = arith.constant 0 : i32
    %42 = tpu.memref_slice %arg4[%c4_i32_16, %c0_i32_19] : memref<8x128xf32, #tpu.memory_space<vmem>> -> memref<1x128xf32, #tpu.memory_space<vmem>>
    %43 = tpu.memref_squeeze %42 : memref<1x128xf32, #tpu.memory_space<vmem>> -> memref<128xf32, #tpu.memory_space<vmem>>
    %44 = tpu.memref_slice %arg5[%c4_i32_17] : memref<8x!tpu.dma_semaphore, #tpu.memory_space<semaphore_mem>> -> memref<1x!tpu.dma_semaphore, #tpu.memory_space<semaphore_mem>>
    %45 = tpu.memref_squeeze %44 : memref<1x!tpu.dma_semaphore, #tpu.memory_space<semaphore_mem>> -> memref<!tpu.dma_semaphore, #tpu.memory_space<semaphore_mem>>
    tpu.enqueue_dma source(%41 : memref<128xf32, #tpu.memory_space<any>>) target(%43 : memref<128xf32, #tpu.memory_space<vmem>>) target_semaphore(%45 : memref<!tpu.dma_semaphore, #tpu.memory_space<semaphore_mem>>)
    %c5_i32 = arith.constant 5 : i32
    %46 = arith.addi %0, %c5_i32 : i32
    %47 = arith.index_cast %46 : i32 to index
    %48 = memref.load %arg1[%47] : memref<16xi32, #tpu.memory_space<smem>>
    %c5_i32_20 = arith.constant 5 : i32
    %c5_i32_21 = arith.constant 5 : i32
    %c0_i32_22 = arith.constant 0 : i32
    %49 = tpu.memref_slice %arg2[%48, %c0_i32_22] : memref<160x128xf32, #tpu.memory_space<any>> -> memref<1x128xf32, #tpu.memory_space<any>>
    %50 = tpu.memref_squeeze %49 : memref<1x128xf32, #tpu.memory_space<any>> -> memref<128xf32, #tpu.memory_space<any>>
    %c0_i32_23 = arith.constant 0 : i32
    %51 = tpu.memref_slice %arg4[%c5_i32_20, %c0_i32_23] : memref<8x128xf32, #tpu.memory_space<vmem>> -> memref<1x128xf32, #tpu.memory_space<vmem>>
    %52 = tpu.memref_squeeze %51 : memref<1x128xf32, #tpu.memory_space<vmem>> -> memref<128xf32, #tpu.memory_space<vmem>>
    %53 = tpu.memref_slice %arg5[%c5_i32_21] : memref<8x!tpu.dma_semaphore, #tpu.memory_space<semaphore_mem>> -> memref<1x!tpu.dma_semaphore, #tpu.memory_space<semaphore_mem>>
    %54 = tpu.memref_squeeze %53 : memref<1x!tpu.dma_semaphore, #tpu.memory_space<semaphore_mem>> -> memref<!tpu.dma_semaphore, #tpu.memory_space<semaphore_mem>>
    tpu.enqueue_dma source(%50 : memref<128xf32, #tpu.memory_space<any>>) target(%52 : memref<128xf32, #tpu.memory_space<vmem>>) target_semaphore(%54 : memref<!tpu.dma_semaphore, #tpu.memory_space<semaphore_mem>>)
    %c6_i32 = arith.constant 6 : i32
    %55 = arith.addi %0, %c6_i32 : i32
    %56 = arith.index_cast %55 : i32 to index
    %57 = memref.load %arg1[%56] : memref<16xi32, #tpu.memory_space<smem>>
    %c6_i32_24 = arith.constant 6 : i32
    %c6_i32_25 = arith.constant 6 : i32
    %c0_i32_26 = arith.constant 0 : i32
    %58 = tpu.memref_slice %arg2[%57, %c0_i32_26] : memref<160x128xf32, #tpu.memory_space<any>> -> memref<1x128xf32, #tpu.memory_space<any>>
    %59 = tpu.memref_squeeze %58 : memref<1x128xf32, #tpu.memory_space<any>> -> memref<128xf32, #tpu.memory_space<any>>
    %c0_i32_27 = arith.constant 0 : i32
    %60 = tpu.memref_slice %arg4[%c6_i32_24, %c0_i32_27] : memref<8x128xf32, #tpu.memory_space<vmem>> -> memref<1x128xf32, #tpu.memory_space<vmem>>
    %61 = tpu.memref_squeeze %60 : memref<1x128xf32, #tpu.memory_space<vmem>> -> memref<128xf32, #tpu.memory_space<vmem>>
    %62 = tpu.memref_slice %arg5[%c6_i32_25] : memref<8x!tpu.dma_semaphore, #tpu.memory_space<semaphore_mem>> -> memref<1x!tpu.dma_semaphore, #tpu.memory_space<semaphore_mem>>
    %63 = tpu.memref_squeeze %62 : memref<1x!tpu.dma_semaphore, #tpu.memory_space<semaphore_mem>> -> memref<!tpu.dma_semaphore, #tpu.memory_space<semaphore_mem>>
    tpu.enqueue_dma source(%59 : memref<128xf32, #tpu.memory_space<any>>) target(%61 : memref<128xf32, #tpu.memory_space<vmem>>) target_semaphore(%63 : memref<!tpu.dma_semaphore, #tpu.memory_space<semaphore_mem>>)
    %c7_i32 = arith.constant 7 : i32
    %64 = arith.addi %0, %c7_i32 : i32
    %65 = arith.index_cast %64 : i32 to index
    %66 = memref.load %arg1[%65] : memref<16xi32, #tpu.memory_space<smem>>
    %c7_i32_28 = arith.constant 7 : i32
    %c7_i32_29 = arith.constant 7 : i32
    %c0_i32_30 = arith.constant 0 : i32
    %67 = tpu.memref_slice %arg2[%66, %c0_i32_30] : memref<160x128xf32, #tpu.memory_space<any>> -> memref<1x128xf32, #tpu.memory_space<any>>
    %68 = tpu.memref_squeeze %67 : memref<1x128xf32, #tpu.memory_space<any>> -> memref<128xf32, #tpu.memory_space<any>>
    %c0_i32_31 = arith.constant 0 : i32
    %69 = tpu.memref_slice %arg4[%c7_i32_28, %c0_i32_31] : memref<8x128xf32, #tpu.memory_space<vmem>> -> memref<1x128xf32, #tpu.memory_space<vmem>>
    %70 = tpu.memref_squeeze %69 : memref<1x128xf32, #tpu.memory_space<vmem>> -> memref<128xf32, #tpu.memory_space<vmem>>
    %71 = tpu.memref_slice %arg5[%c7_i32_29] : memref<8x!tpu.dma_semaphore, #tpu.memory_space<semaphore_mem>> -> memref<1x!tpu.dma_semaphore, #tpu.memory_space<semaphore_mem>>
    %72 = tpu.memref_squeeze %71 : memref<1x!tpu.dma_semaphore, #tpu.memory_space<semaphore_mem>> -> memref<!tpu.dma_semaphore, #tpu.memory_space<semaphore_mem>>
    tpu.enqueue_dma source(%68 : memref<128xf32, #tpu.memory_space<any>>) target(%70 : memref<128xf32, #tpu.memory_space<vmem>>) target_semaphore(%72 : memref<!tpu.dma_semaphore, #tpu.memory_space<semaphore_mem>>)
    %c0_i32_32 = arith.constant 0 : i32
    %c0_i32_33 = arith.constant 0 : i32
    %c0_i32_34 = arith.constant 0 : i32
    %73 = tpu.memref_slice %arg2[%3, %c0_i32_34] : memref<160x128xf32, #tpu.memory_space<any>> -> memref<1x128xf32, #tpu.memory_space<any>>
    %74 = tpu.memref_squeeze %73 : memref<1x128xf32, #tpu.memory_space<any>> -> memref<128xf32, #tpu.memory_space<any>>
    %c0_i32_35 = arith.constant 0 : i32
    %75 = tpu.memref_slice %arg4[%c0_i32_32, %c0_i32_35] : memref<8x128xf32, #tpu.memory_space<vmem>> -> memref<1x128xf32, #tpu.memory_space<vmem>>
    %76 = tpu.memref_squeeze %75 : memref<1x128xf32, #tpu.memory_space<vmem>> -> memref<128xf32, #tpu.memory_space<vmem>>
    %77 = tpu.memref_slice %arg5[%c0_i32_33] : memref<8x!tpu.dma_semaphore, #tpu.memory_space<semaphore_mem>> -> memref<1x!tpu.dma_semaphore, #tpu.memory_space<semaphore_mem>>
    %78 = tpu.memref_squeeze %77 : memref<1x!tpu.dma_semaphore, #tpu.memory_space<semaphore_mem>> -> memref<!tpu.dma_semaphore, #tpu.memory_space<semaphore_mem>>
    tpu.wait_dma2 semaphore(%78 : memref<!tpu.dma_semaphore, #tpu.memory_space<semaphore_mem>>) src(%74 : memref<128xf32, #tpu.memory_space<any>>) dst(%76 : memref<128xf32, #tpu.memory_space<vmem>>)
    %c1_i32_36 = arith.constant 1 : i32
    %c1_i32_37 = arith.constant 1 : i32
    %c0_i32_38 = arith.constant 0 : i32
    %79 = tpu.memref_slice %arg2[%12, %c0_i32_38] : memref<160x128xf32, #tpu.memory_space<any>> -> memref<1x128xf32, #tpu.memory_space<any>>
    %80 = tpu.memref_squeeze %79 : memref<1x128xf32, #tpu.memory_space<any>> -> memref<128xf32, #tpu.memory_space<any>>
    %c0_i32_39 = arith.constant 0 : i32
    %81 = tpu.memref_slice %arg4[%c1_i32_36, %c0_i32_39] : memref<8x128xf32, #tpu.memory_space<vmem>> -> memref<1x128xf32, #tpu.memory_space<vmem>>
    %82 = tpu.memref_squeeze %81 : memref<1x128xf32, #tpu.memory_space<vmem>> -> memref<128xf32, #tpu.memory_space<vmem>>
    %83 = tpu.memref_slice %arg5[%c1_i32_37] : memref<8x!tpu.dma_semaphore, #tpu.memory_space<semaphore_mem>> -> memref<1x!tpu.dma_semaphore, #tpu.memory_space<semaphore_mem>>
    %84 = tpu.memref_squeeze %83 : memref<1x!tpu.dma_semaphore, #tpu.memory_space<semaphore_mem>> -> memref<!tpu.dma_semaphore, #tpu.memory_space<semaphore_mem>>
    tpu.wait_dma2 semaphore(%84 : memref<!tpu.dma_semaphore, #tpu.memory_space<semaphore_mem>>) src(%80 : memref<128xf32, #tpu.memory_space<any>>) dst(%82 : memref<128xf32, #tpu.memory_space<vmem>>)
    %c2_i32_40 = arith.constant 2 : i32
    %c2_i32_41 = arith.constant 2 : i32
    %c0_i32_42 = arith.constant 0 : i32
    %85 = tpu.memref_slice %arg2[%21, %c0_i32_42] : memref<160x128xf32, #tpu.memory_space<any>> -> memref<1x128xf32, #tpu.memory_space<any>>
    %86 = tpu.memref_squeeze %85 : memref<1x128xf32, #tpu.memory_space<any>> -> memref<128xf32, #tpu.memory_space<any>>
    %c0_i32_43 = arith.constant 0 : i32
    %87 = tpu.memref_slice %arg4[%c2_i32_40, %c0_i32_43] : memref<8x128xf32, #tpu.memory_space<vmem>> -> memref<1x128xf32, #tpu.memory_space<vmem>>
    %88 = tpu.memref_squeeze %87 : memref<1x128xf32, #tpu.memory_space<vmem>> -> memref<128xf32, #tpu.memory_space<vmem>>
    %89 = tpu.memref_slice %arg5[%c2_i32_41] : memref<8x!tpu.dma_semaphore, #tpu.memory_space<semaphore_mem>> -> memref<1x!tpu.dma_semaphore, #tpu.memory_space<semaphore_mem>>
    %90 = tpu.memref_squeeze %89 : memref<1x!tpu.dma_semaphore, #tpu.memory_space<semaphore_mem>> -> memref<!tpu.dma_semaphore, #tpu.memory_space<semaphore_mem>>
    tpu.wait_dma2 semaphore(%90 : memref<!tpu.dma_semaphore, #tpu.memory_space<semaphore_mem>>) src(%86 : memref<128xf32, #tpu.memory_space<any>>) dst(%88 : memref<128xf32, #tpu.memory_space<vmem>>)
    %c3_i32_44 = arith.constant 3 : i32
    %c3_i32_45 = arith.constant 3 : i32
    %c0_i32_46 = arith.constant 0 : i32
    %91 = tpu.memref_slice %arg2[%30, %c0_i32_46] : memref<160x128xf32, #tpu.memory_space<any>> -> memref<1x128xf32, #tpu.memory_space<any>>
    %92 = tpu.memref_squeeze %91 : memref<1x128xf32, #tpu.memory_space<any>> -> memref<128xf32, #tpu.memory_space<any>>
    %c0_i32_47 = arith.constant 0 : i32
    %93 = tpu.memref_slice %arg4[%c3_i32_44, %c0_i32_47] : memref<8x128xf32, #tpu.memory_space<vmem>> -> memref<1x128xf32, #tpu.memory_space<vmem>>
    %94 = tpu.memref_squeeze %93 : memref<1x128xf32, #tpu.memory_space<vmem>> -> memref<128xf32, #tpu.memory_space<vmem>>
    %95 = tpu.memref_slice %arg5[%c3_i32_45] : memref<8x!tpu.dma_semaphore, #tpu.memory_space<semaphore_mem>> -> memref<1x!tpu.dma_semaphore, #tpu.memory_space<semaphore_mem>>
    %96 = tpu.memref_squeeze %95 : memref<1x!tpu.dma_semaphore, #tpu.memory_space<semaphore_mem>> -> memref<!tpu.dma_semaphore, #tpu.memory_space<semaphore_mem>>
    tpu.wait_dma2 semaphore(%96 : memref<!tpu.dma_semaphore, #tpu.memory_space<semaphore_mem>>) src(%92 : memref<128xf32, #tpu.memory_space<any>>) dst(%94 : memref<128xf32, #tpu.memory_space<vmem>>)
    %c4_i32_48 = arith.constant 4 : i32
    %c4_i32_49 = arith.constant 4 : i32
    %c0_i32_50 = arith.constant 0 : i32
    %97 = tpu.memref_slice %arg2[%39, %c0_i32_50] : memref<160x128xf32, #tpu.memory_space<any>> -> memref<1x128xf32, #tpu.memory_space<any>>
    %98 = tpu.memref_squeeze %97 : memref<1x128xf32, #tpu.memory_space<any>> -> memref<128xf32, #tpu.memory_space<any>>
    %c0_i32_51 = arith.constant 0 : i32
    %99 = tpu.memref_slice %arg4[%c4_i32_48, %c0_i32_51] : memref<8x128xf32, #tpu.memory_space<vmem>> -> memref<1x128xf32, #tpu.memory_space<vmem>>
    %100 = tpu.memref_squeeze %99 : memref<1x128xf32, #tpu.memory_space<vmem>> -> memref<128xf32, #tpu.memory_space<vmem>>
    %101 = tpu.memref_slice %arg5[%c4_i32_49] : memref<8x!tpu.dma_semaphore, #tpu.memory_space<semaphore_mem>> -> memref<1x!tpu.dma_semaphore, #tpu.memory_space<semaphore_mem>>
    %102 = tpu.memref_squeeze %101 : memref<1x!tpu.dma_semaphore, #tpu.memory_space<semaphore_mem>> -> memref<!tpu.dma_semaphore, #tpu.memory_space<semaphore_mem>>
    tpu.wait_dma2 semaphore(%102 : memref<!tpu.dma_semaphore, #tpu.memory_space<semaphore_mem>>) src(%98 : memref<128xf32, #tpu.memory_space<any>>) dst(%100 : memref<128xf32, #tpu.memory_space<vmem>>)
    %c5_i32_52 = arith.constant 5 : i32
    %c5_i32_53 = arith.constant 5 : i32
    %c0_i32_54 = arith.constant 0 : i32
    %103 = tpu.memref_slice %arg2[%48, %c0_i32_54] : memref<160x128xf32, #tpu.memory_space<any>> -> memref<1x128xf32, #tpu.memory_space<any>>
    %104 = tpu.memref_squeeze %103 : memref<1x128xf32, #tpu.memory_space<any>> -> memref<128xf32, #tpu.memory_space<any>>
    %c0_i32_55 = arith.constant 0 : i32
    %105 = tpu.memref_slice %arg4[%c5_i32_52, %c0_i32_55] : memref<8x128xf32, #tpu.memory_space<vmem>> -> memref<1x128xf32, #tpu.memory_space<vmem>>
    %106 = tpu.memref_squeeze %105 : memref<1x128xf32, #tpu.memory_space<vmem>> -> memref<128xf32, #tpu.memory_space<vmem>>
    %107 = tpu.memref_slice %arg5[%c5_i32_53] : memref<8x!tpu.dma_semaphore, #tpu.memory_space<semaphore_mem>> -> memref<1x!tpu.dma_semaphore, #tpu.memory_space<semaphore_mem>>
    %108 = tpu.memref_squeeze %107 : memref<1x!tpu.dma_semaphore, #tpu.memory_space<semaphore_mem>> -> memref<!tpu.dma_semaphore, #tpu.memory_space<semaphore_mem>>
    tpu.wait_dma2 semaphore(%108 : memref<!tpu.dma_semaphore, #tpu.memory_space<semaphore_mem>>) src(%104 : memref<128xf32, #tpu.memory_space<any>>) dst(%106 : memref<128xf32, #tpu.memory_space<vmem>>)
    %c6_i32_56 = arith.constant 6 : i32
    %c6_i32_57 = arith.constant 6 : i32
    %c0_i32_58 = arith.constant 0 : i32
    %109 = tpu.memref_slice %arg2[%57, %c0_i32_58] : memref<160x128xf32, #tpu.memory_space<any>> -> memref<1x128xf32, #tpu.memory_space<any>>
    %110 = tpu.memref_squeeze %109 : memref<1x128xf32, #tpu.memory_space<any>> -> memref<128xf32, #tpu.memory_space<any>>
    %c0_i32_59 = arith.constant 0 : i32
    %111 = tpu.memref_slice %arg4[%c6_i32_56, %c0_i32_59] : memref<8x128xf32, #tpu.memory_space<vmem>> -> memref<1x128xf32, #tpu.memory_space<vmem>>
    %112 = tpu.memref_squeeze %111 : memref<1x128xf32, #tpu.memory_space<vmem>> -> memref<128xf32, #tpu.memory_space<vmem>>
    %113 = tpu.memref_slice %arg5[%c6_i32_57] : memref<8x!tpu.dma_semaphore, #tpu.memory_space<semaphore_mem>> -> memref<1x!tpu.dma_semaphore, #tpu.memory_space<semaphore_mem>>
    %114 = tpu.memref_squeeze %113 : memref<1x!tpu.dma_semaphore, #tpu.memory_space<semaphore_mem>> -> memref<!tpu.dma_semaphore, #tpu.memory_space<semaphore_mem>>
    tpu.wait_dma2 semaphore(%114 : memref<!tpu.dma_semaphore, #tpu.memory_space<semaphore_mem>>) src(%110 : memref<128xf32, #tpu.memory_space<any>>) dst(%112 : memref<128xf32, #tpu.memory_space<vmem>>)
    %c7_i32_60 = arith.constant 7 : i32
    %c7_i32_61 = arith.constant 7 : i32
    %c0_i32_62 = arith.constant 0 : i32
    %115 = tpu.memref_slice %arg2[%66, %c0_i32_62] : memref<160x128xf32, #tpu.memory_space<any>> -> memref<1x128xf32, #tpu.memory_space<any>>
    %116 = tpu.memref_squeeze %115 : memref<1x128xf32, #tpu.memory_space<any>> -> memref<128xf32, #tpu.memory_space<any>>
    %c0_i32_63 = arith.constant 0 : i32
    %117 = tpu.memref_slice %arg4[%c7_i32_60, %c0_i32_63] : memref<8x128xf32, #tpu.memory_space<vmem>> -> memref<1x128xf32, #tpu.memory_space<vmem>>
    %118 = tpu.memref_squeeze %117 : memref<1x128xf32, #tpu.memory_space<vmem>> -> memref<128xf32, #tpu.memory_space<vmem>>
    %119 = tpu.memref_slice %arg5[%c7_i32_61] : memref<8x!tpu.dma_semaphore, #tpu.memory_space<semaphore_mem>> -> memref<1x!tpu.dma_semaphore, #tpu.memory_space<semaphore_mem>>
    %120 = tpu.memref_squeeze %119 : memref<1x!tpu.dma_semaphore, #tpu.memory_space<semaphore_mem>> -> memref<!tpu.dma_semaphore, #tpu.memory_space<semaphore_mem>>
    tpu.wait_dma2 semaphore(%120 : memref<!tpu.dma_semaphore, #tpu.memory_space<semaphore_mem>>) src(%116 : memref<128xf32, #tpu.memory_space<any>>) dst(%118 : memref<128xf32, #tpu.memory_space<vmem>>)
    %c0 = arith.constant 0 : index
    %c0_64 = arith.constant 0 : index
    %121 = vector.load %arg4[%c0, %c0_64] : memref<8x128xf32, #tpu.memory_space<vmem>>, vector<8x128xf32>
    %c0_65 = arith.constant 0 : index
    %c0_66 = arith.constant 0 : index
    %122 = vector.load %arg3[%c0_65, %c0_66] : memref<8x128xf32, #tpu.memory_space<vmem>>, vector<8x128xf32>
    tpu.vector_store %arg3[%c0_65, %c0_66], %121 {strides = array<i32>} : memref<8x128xf32, #tpu.memory_space<vmem>>, vector<8x128xf32>,
    return
  }
  func.func @transform_1(%arg0: i32, %arg1: memref<16xi32, #tpu.memory_space<smem>>) -> (i32, i32) {
    %c0_i32 = arith.constant 0 : i32
    %c0_i32_0 = arith.constant 0 : i32
    return %arg0, %c0_i32 : i32, i32
  }
}

</mosaic_0001>

<bundles_post_ra>
// kernel: tpu_custom_call.1
= control target key start
LH: loop header
LB: loop body
LE: loop exit
PB: predicated region body
PF: predicated region fallthrough
CT: control target
= control target key end

     0   :  { %s673_s12 = smov [#allocation5]   ;;  %s866_s0 = inlined_call_operand.hbm [shape: s32[16], index: 0, kind: input, shape index: {}]   ;;  %s867_s1 = inlined_call_operand.hbm [shape: f32[160,128], index: 1, kind: input, shape index: {}]   ;;  %s868_s2 = inlined_call_operand.hbm [shape: f32[16,128], index: 2, kind: output, shape index: {}]  }
   0x1   :  { %s8_s11 = sshll.u32 %s866_s0, 4  ;;  %s9_s11 = int_to_ptr.hbm [resolvable:$true] %s8_s11 }
   0x2   :  { %11 = dma.hbm_to_smem %s9_s11, 16, %s673_s12, [#allocation4] }
   0x3   :  { %639 = dma.done.wait [#allocation4], 16 }
   0x4   :  { %640 = vsyncadd [#allocation4], 4294967280 }
   0x5   :  { %14 = sfence }
   0x6   :  { %15 = vsyncpa [#allocation7], 0 }
   0x7   :  { %17 = vsyncpa [#allocation7 + $0x1], 0  ;;  %s700_s13 = smov 0   ;;  %s702_s14 = smov 0  }
   0x8   :  { %s704_s15 = smov 0  }
   0x9 LB: > { %s338_s0 = sadd.s32 4294967295, %s671_s15   ;;  %s717_s16 = sadd.s32 1, %s671_s15   ;;  %s671_s15 = sphi %s704_s15, %s873_s15   ;;  %s667_s14 = sphi %s702_s14, %s872_s14   ;;  %s663_s13 = sphi %s700_s13, %s871_s13  }
   0xa   : > { %s26_s17 = ssub.s32 %s671_s15, %s717_s16  ;;  %s29_s18 = sadd.s32 1, %s667_s14 }
   0xb   : > { %p27_p0 = scmp.eq.s32.totalorder %s26_s17, 0  ;;  %p339_p1 = scmp.ne.s32.totalorder %s26_s17, 0 }
   0xc   : > { %p33_p2 = scmp.eq.s32.totalorder %s671_s15, 1  ;;  %p38_p3 = scmp.ne.s32.totalorder %s667_s14, %s663_s13 }
   0xd   : > { %s726_s19 = scalar_select %p27_p0, %s667_s14, %s29_s18  }
   0xe   : > { %p728_p4 = por %p339_p1, %p33_p2  ;;  %p39_p5 = scmp.eq.s32.totalorder %s338_s0, 1 }
   0xf   : > { %p340_p7 = scmp.ge.s32.totalorder %s671_s15, 2 }
  0x10   : > { %p732_p6 = por %p39_p5, %p38_p3  ;;  %s53_s22 = sand.u32 (!%p340_p7), 1, %s667_s14  }
  0x11   : > { %48 = sbr.rel (%p340_p7) target bundleno = 156 (0x9c), region = 12  ;;  %s739_s23 = sshll.u32 (!%p340_p7), %s671_s15, 3 }
  0x12   : > { %s743_s24 = sshll.u32 (!%p340_p7), %s53_s22, 3  ;;  %s57_s25 = sld [smem:[#allocation5 + %s739_s23]] (!%p340_p7) }
  0x13   : > { %s674_s26 = smov (!%p340_p7), [#allocation2]   ;;  %s72_s28 = sadd.s32 (!%p340_p7), 1, %s739_s23 }
  0x14   : > { %s68_s27 = sshll.u32 (!%p340_p7), %s674_s26, 4  ;;  %s73_s29 = sld [smem:[#allocation5 + %s72_s28]] (!%p340_p7)  ;;  %s69_s27 = int_to_ptr.vmem [resolvable:$true] %s68_s27 }
  0x15   : > { %s90_s30 = sadd.s32 (!%p340_p7), 2, %s739_s23  ;;  %s675_s3 = smov (!%p340_p7), [#allocation2 + $0x1]  }
  0x16   : > { %s748_s4 = sshll.u32 %s675_s3, 4  ;;  %s91_s5 = sld [smem:[#allocation5 + %s90_s30]]  ;;  %s87_s4 = int_to_ptr.vmem [resolvable:$true] %s748_s4 }
  0x17   : > { %s676_s10 = smov [#allocation2 + $0x2]   ;;  %s759_s26 = scalar_lea.hbm %s867_s1, 160 }
  0x18   : > { %s58_s8 = scalar_lea.hbm %s867_s1, %s57_s25  ;;  %s754_s11 = sshll.u32 %s676_s10, 4  ;;  %s105_s11 = int_to_ptr.vmem [resolvable:$true] %s754_s11 }
  0x19   : > { %s66_s9 = sshll.u32 %s58_s8, 4  ;;  %s67_s9 = int_to_ptr.hbm [resolvable:$true] %s66_s9 }
  0x1a   : > { %s407_s12 = sshra.s32 %s67_s9, 4  ;;  %s408_s12 = int_to_ptr.hbm [resolvable:$true] %s407_s12 }
  0x1b   : > { %s409_s0 = scalar_lea.hbm %s408_s12, 1  ;;  %p412_p9 = scmp.lt.s32.totalorder %s408_s12, %s867_s1 }
  0x1c   : > { %p410_p8 = scmp.ne.s32.totalorder %s408_s12, %s409_s0  ;;  %p413_p10 = scmp.lt.s32.totalorder %s759_s26, %s409_s0 }
  0x1e   : > { %p414_p11 = por %p413_p10, %p412_p9 }
  0x20   : > { %p415_p12 = pnand %p414_p11, %p410_p8 }
  0x22   : > { %418 = shalt.err (!%p415_p12)  }
  0x23   : > { %71 = dma.hbm_to_vmem [thread:$0]  %s67_s9, 16, %s69_s27, [#allocation3] }
  0x24   : > { %s74_s6 = scalar_lea.hbm %s867_s1, %s73_s29  ;;  %s92_s17 = scalar_lea.hbm %s867_s1, %s91_s5 }
  0x25   : > { %s84_s7 = sshll.u32 %s74_s6, 4  ;;  %s102_s18 = sshll.u32 %s92_s17, 4  ;;  %s85_s7 = int_to_ptr.hbm [resolvable:$true] %s84_s7  ;;  %s103_s18 = int_to_ptr.hbm [resolvable:$true] %s102_s18 }
  0x26   : > { %s431_s12 = sshra.s32 %s85_s7, 4  ;;  %s432_s12 = int_to_ptr.hbm [resolvable:$true] %s431_s12 }
  0x27   : > { %s433_s0 = scalar_lea.hbm %s432_s12, 1  ;;  %p436_p0 = scmp.lt.s32.totalorder %s432_s12, %s867_s1 }
  0x28   : > { %p434_p13 = scmp.ne.s32.totalorder %s432_s12, %s433_s0  ;;  %p437_p1 = scmp.lt.s32.totalorder %s759_s26, %s433_s0 }
  0x2a   : > { %p438_p2 = por %p437_p1, %p436_p0 }
  0x2c   : > { %p439_p3 = pnand %p438_p2, %p434_p13 }
  0x2e   : > { %442 = shalt.err (!%p439_p3)  }
  0x2f   : > { %89 = dma.hbm_to_vmem [thread:$0]  %s85_s7, 16, %s87_s4, [#allocation3 + $0x1] }
  0x30   : > { %s108_s29 = sadd.s32 3, %s739_s23  ;;  %s455_s5 = sshra.s32 %s103_s18, 4  ;;  %s456_s5 = int_to_ptr.hbm [resolvable:$true] %s455_s5 }
  0x31   : > { %s457_s9 = scalar_lea.hbm %s456_s5, 1  ;;  %p460_p7 = scmp.lt.s32.totalorder %s456_s5, %s867_s1 }
  0x32   : > { %p458_p5 = scmp.ne.s32.totalorder %s456_s5, %s457_s9  ;;  %p461_p8 = scmp.lt.s32.totalorder %s759_s26, %s457_s9 }
  0x34   : > { %p462_p9 = por %p461_p8, %p460_p7 }
  0x36   : > { %p463_p10 = pnand %p462_p9, %p458_p5 }
  0x38   : > { %466 = shalt.err (!%p463_p10)  }
  0x39   : > { %107 = dma.hbm_to_vmem [thread:$0]  %s103_s18, 16, %s105_s11, [#allocation3 + $0x2] }
  0x3a   : > { %s109_s3 = sld [smem:[#allocation5 + %s108_s29]]  ;;  %s677_s6 = smov [#allocation2 + $0x3]  }
  0x3b   : > { %s122_s4 = sshll.u32 %s677_s6, 4  ;;  %s126_s7 = sadd.s32 4, %s739_s23  ;;  %s123_s4 = int_to_ptr.vmem [resolvable:$true] %s122_s4 }
  0x3c   : > { %s127_s8 = sld [smem:[#allocation5 + %s126_s7]]  ;;  %s144_s10 = sadd.s32 5, %s739_s23 }
  0x3d   : > { %s678_s17 = smov [#allocation2 + $0x4]   ;;  %s145_s0 = sld [smem:[#allocation5 + %s144_s10]] }
  0x3e   : > { %s785_s12 = sshll.u32 %s678_s17, 4  ;;  %s679_s18 = smov [#allocation2 + $0x5]   ;;  %s141_s12 = int_to_ptr.vmem [resolvable:$true] %s785_s12 }
  0x3f   : > { %s791_s5 = sshll.u32 %s679_s18, 4  ;;  %s159_s5 = int_to_ptr.vmem [resolvable:$true] %s791_s5 }
  0x40   : > { %s110_s11 = scalar_lea.hbm %s867_s1, %s109_s3 }
  0x41   : > { %s120_s29 = sshll.u32 %s110_s11, 4  ;;  %s121_s29 = int_to_ptr.hbm [resolvable:$true] %s120_s29 }
  0x42   : > { %s128_s25 = scalar_lea.hbm %s867_s1, %s127_s8  ;;  %s479_s6 = sshra.s32 %s121_s29, 4  ;;  %s480_s6 = int_to_ptr.hbm [resolvable:$true] %s479_s6 }
  0x43   : > { %s481_s7 = scalar_lea.hbm %s480_s6, 1  ;;  %p484_p12 = scmp.lt.s32.totalorder %s480_s6, %s867_s1 }
  0x44   : > { %p482_p11 = scmp.ne.s32.totalorder %s480_s6, %s481_s7  ;;  %p485_p13 = scmp.lt.s32.totalorder %s759_s26, %s481_s7 }
  0x46   : > { %p486_p0 = por %p485_p13, %p484_p12 }
  0x48   : > { %p487_p1 = pnand %p486_p0, %p482_p11 }
  0x4a   : > { %490 = shalt.err (!%p487_p1)  }
  0x4b   : > { %125 = dma.hbm_to_vmem [thread:$0]  %s121_s29, 16, %s123_s4, [#allocation3 + $0x3] }
  0x4c   : > { %s138_s3 = sshll.u32 %s128_s25, 4  ;;  %s146_s11 = scalar_lea.hbm %s867_s1, %s145_s0  ;;  %s139_s3 = int_to_ptr.hbm [resolvable:$true] %s138_s3 }
  0x4d   : > { %s156_s8 = sshll.u32 %s146_s11, 4  ;;  %s503_s18 = sshra.s32 %s139_s3, 4  ;;  %s504_s18 = int_to_ptr.hbm [resolvable:$true] %s503_s18  ;;  %s157_s8 = int_to_ptr.hbm [resolvable:$true] %s156_s8 }
  0x4e   : > { %s505_s9 = scalar_lea.hbm %s504_s18, 1  ;;  %p508_p3 = scmp.lt.s32.totalorder %s504_s18, %s867_s1 }
  0x4f   : > { %p506_p2 = scmp.ne.s32.totalorder %s504_s18, %s505_s9  ;;  %p509_p5 = scmp.lt.s32.totalorder %s759_s26, %s505_s9 }
  0x51   : > { %p510_p7 = por %p509_p5, %p508_p3 }
  0x53   : > { %p511_p8 = pnand %p510_p7, %p506_p2 }
  0x55   : > { %514 = shalt.err (!%p511_p8)  }
  0x56   : > { %143 = dma.hbm_to_vmem [thread:$0]  %s139_s3, 16, %s141_s12, [#allocation3 + $0x4] }
  0x57   : > { %s162_s4 = sadd.s32 6, %s739_s23  ;;  %s527_s0 = sshra.s32 %s157_s8, 4  ;;  %s528_s0 = int_to_ptr.hbm [resolvable:$true] %s527_s0 }
  0x58   : > { %s529_s29 = scalar_lea.hbm %s528_s0, 1  ;;  %p532_p10 = scmp.lt.s32.totalorder %s528_s0, %s867_s1 }
  0x59   : > { %p530_p9 = scmp.ne.s32.totalorder %s528_s0, %s529_s29  ;;  %p533_p11 = scmp.lt.s32.totalorder %s759_s26, %s529_s29 }
  0x5b   : > { %p534_p12 = por %p533_p11, %p532_p10 }
  0x5d   : > { %p535_p13 = pnand %p534_p12, %p530_p9 }
  0x5f   : > { %538 = shalt.err (!%p535_p13)  }
  0x60   : > { %161 = dma.hbm_to_vmem [thread:$0]  %s157_s8, 16, %s159_s5, [#allocation3 + $0x5] }
  0x61   : > { %s163_s7 = sld [smem:[#allocation5 + %s162_s4]]  ;;  %s180_s12 = sadd.s32 7, %s739_s23 }
  0x62   : > { %s181_s17 = sld [smem:[#allocation5 + %s180_s12]]  ;;  %s680_s3 = smov [#allocation2 + $0x6]  }
  0x63   : > { %s176_s28 = sshll.u32 %s680_s3, 4  ;;  %s681_s27 = smov [#allocation2 + $0x7]   ;;  %s177_s28 = int_to_ptr.vmem [resolvable:$true] %s176_s28 }
  0x64   : > { %s818_s11 = sshll.u32 %s681_s27, 4  ;;  %s195_s11 = int_to_ptr.vmem [resolvable:$true] %s818_s11 }
  0x67   : > { %s164_s30 = scalar_lea.hbm %s867_s1, %s163_s7 }
  0x68   : > { %s174_s10 = sshll.u32 %s164_s30, 4  ;;  %s182_s8 = scalar_lea.hbm %s867_s1, %s181_s17  ;;  %s175_s10 = int_to_ptr.hbm [resolvable:$true] %s174_s10 }
  0x69   : > { %s551_s4 = sshra.s32 %s175_s10, 4  ;;  %s552_s4 = int_to_ptr.hbm [resolvable:$true] %s551_s4 }
  0x6a   : > { %s553_s29 = scalar_lea.hbm %s552_s4, 1  ;;  %p556_p1 = scmp.lt.s32.totalorder %s552_s4, %s867_s1 }
  0x6b   : > { %p554_p0 = scmp.ne.s32.totalorder %s552_s4, %s553_s29  ;;  %p557_p2 = scmp.lt.s32.totalorder %s759_s26, %s553_s29 }
  0x6d   : > { %p558_p3 = por %p557_p2, %p556_p1 }
  0x6f   : > { %p559_p5 = pnand %p558_p3, %p554_p0 }
  0x71   : > { %562 = shalt.err (!%p559_p5)  }
  0x72   : > { %179 = dma.hbm_to_vmem [thread:$0]  %s175_s10, 16, %s177_s28, [#allocation3 + $0x6] }
  0x73   : > { %s192_s7 = sshll.u32 %s182_s8, 4  ;;  %s193_s7 = int_to_ptr.hbm [resolvable:$true] %s192_s7 }
  0x74   : > { %s575_s12 = sshra.s32 %s193_s7, 4  ;;  %s576_s12 = int_to_ptr.hbm [resolvable:$true] %s575_s12 }
  0x75   : > { %s577_s3 = scalar_lea.hbm %s576_s12, 1  ;;  %p580_p8 = scmp.lt.s32.totalorder %s576_s12, %s867_s1 }
  0x76   : > { %p578_p7 = scmp.ne.s32.totalorder %s576_s12, %s577_s3  ;;  %p581_p9 = scmp.lt.s32.totalorder %s759_s26, %s577_s3 }
  0x78   : > { %p582_p10 = por %p581_p9, %p580_p8 }
  0x7a   : > { %p583_p11 = pnand %p582_p10, %p578_p7 }
  0x7c   : > { %586 = shalt.err (!%p583_p11)  }
  0x7d   : > { %197 = dma.hbm_to_vmem [thread:$0]  %s193_s7, 16, %s195_s11, [#allocation3 + $0x7] }
  0x7e   : > { %s55_s18 = scalar_lea.vmem [#allocation6], %s743_s24 }
  0x7f   : > { %641 = dma.done.wait [#allocation3], 16 }
  0x80   : > { %642 = vsyncadd [#allocation3], 4294967280 }
  0x81   : > { %643 = dma.done.wait [#allocation3 + $0x1], 16 }
  0x82   : > { %644 = vsyncadd [#allocation3 + $0x1], 4294967280 }
  0x83   : > { %645 = dma.done.wait [#allocation3 + $0x2], 16 }
  0x84   : > { %646 = vsyncadd [#allocation3 + $0x2], 4294967280 }
  0x85   : > { %647 = dma.done.wait [#allocation3 + $0x3], 16 }
  0x86   : > { %648 = vsyncadd [#allocation3 + $0x3], 4294967280 }
  0x87   : > { %649 = dma.done.wait [#allocation3 + $0x4], 16 }
  0x88   : > { %650 = vsyncadd [#allocation3 + $0x4], 4294967280 }
  0x89   : > { %651 = dma.done.wait [#allocation3 + $0x5], 16 }
  0x8a   : > { %652 = vsyncadd [#allocation3 + $0x5], 4294967280 }
  0x8b   : > { %653 = dma.done.wait [#allocation3 + $0x6], 16 }
  0x8c   : > { %654 = vsyncadd [#allocation3 + $0x6], 4294967280 }
  0x8d   : > { %655 = dma.done.wait [#allocation3 + $0x7], 16 }
  0x8e   : > { %656 = vsyncadd [#allocation3 + $0x7], 4294967280  ;;  %s227_s24 = scalar_lea.hbm %s868_s2, %s739_s23  ;;  %s229_s11 = sshll.u32 %s55_s18, 4  ;;  %v214_v0 = vld [vmem:[#allocation2] sm:$0xff]  ;;  %s230_s11 = int_to_ptr.vmem [resolvable:$true] %s229_s11 }
  0x8f   : > { %s231_s9 = sshll.u32 %s227_s24, 4  ;;  %215 = vst [vmem:[%s55_s18] sm:$0xff] %v214_v0  ;;  %s217_s30 = scalar_lea.sflag [#allocation7], %s53_s22  ;;  %s232_s9 = int_to_ptr.hbm [resolvable:$true] %s231_s9 }
  0x90   : > { %s613_s10 = sshra.s32 %s232_s9, 4  ;;  %s619_s4 = scalar_lea.hbm %s868_s2, 16  ;;  %s614_s10 = int_to_ptr.hbm [resolvable:$true] %s613_s10 }
  0x91   : > { %s615_s0 = scalar_lea.hbm %s614_s10, 8  ;;  %p620_p1 = scmp.lt.s32.totalorder %s614_s10, %s868_s2 }
  0x92   : > { %p616_p12 = scmp.ne.s32.totalorder %s614_s10, %s615_s0  ;;  %p621_p2 = scmp.lt.s32.totalorder %s619_s4, %s615_s0 }
  0x94   : > { %p617_p13 = pnand %p616_p12, %p728_p4  ;;  %p622_p3 = por %p621_p2, %p620_p1 }
  0x96   : > { %p618_p0 = pneg %p617_p13 }
  0x98   : > { %p623_p5 = pnand %p622_p3, %p618_p0 }
  0x9a   : > { %626 = shalt.err (!%p623_p5)
}
  0x9b   : > { %355 = dma.vmem_to_hbm [thread:$0]  (%p728_p4), %s230_s11, 128, %s232_s9, %s217_s30  }
  0x9c PF: > { %p361_p7 = scmp.ge.s32.totalorder %s671_s15, 1  ;;  %s243_s22 = sand.u32 1, %s663_s13  }
  0x9d   : > { %s244_s25 = scalar_lea.sflag [#allocation7], %s243_s22 }
  0x9e   : > { %p358_p8 = pnand %p361_p7, %p732_p6 }
  0xa0   : > { %p359_p9 = pneg %p358_p8 }
  0xa2   : > { %658 = dma.done.wait (%p359_p9), %s244_s25, 128  }
  0xa3   : > { %660 = vsyncadd (%p359_p9), %s244_s25, 4294967168  ;;  %p20_p10 = scmp.ge.s32.totalorder %s717_s16, 3   ;;  %s871_s13 = smov %s667_s14 }
  0xa4   : > { %s872_s14 = smov %s726_s19  ;;  %s873_s15 = smov %s717_s16 }
  0xa5   :  { %22 = sbr.rel (!%p20_p10) target bundleno = 9 (0x9), region = 105 }
  0xaa   :  { %250 = vsyncpa [#allocation7], 1 }
  0xab   :  { %252 = vsyncpa [#allocation7 + $0x1], 1 }
  0xac   :  { %253 = vsyncmov [#allocation3] }
  0xaf   :  { %s254_s15 = vpop.sfrf %253 }
  0xb0   :  { %p347_p4 = scmp.ne.s32.totalorder %s254_s15, 0 }
  0xb2   :  { %258 = shalt.err (%p347_p4)  }
  0xb3   :  { %260 = vsyncmov [#allocation3 + $0x1] }
  0xb6   :  { %s261_s20 = vpop.sfrf %260 }
  0xb7   :  { %p348_p6 = scmp.ne.s32.totalorder %s261_s20, 0 }
  0xb9   :  { %265 = shalt.err (%p348_p6)  }
  0xba   :  { %267 = vsyncmov [#allocation3 + $0x2] }
  0xbd   :  { %s268_s21 = vpop.sfrf %267 }
  0xbe   :  { %p349_p11 = scmp.ne.s32.totalorder %s268_s21, 0 }
  0xc0   :  { %272 = shalt.err (%p349_p11)  }
  0xc1   :  { %274 = vsyncmov [#allocation3 + $0x3] }
  0xc4   :  { %s275_s6 = vpop.sfrf %274 }
  0xc5   :  { %p350_p12 = scmp.ne.s32.totalorder %s275_s6, 0 }
  0xc7   :  { %279 = shalt.err (%p350_p12)  }
  0xc8   :  { %281 = vsyncmov [#allocation3 + $0x4] }
  0xcb   :  { %s282_s16 = vpop.sfrf %281 }
  0xcc   :  { %p351_p13 = scmp.ne.s32.totalorder %s282_s16, 0 }
  0xce   :  { %286 = shalt.err (%p351_p13)  }
  0xcf   :  { %288 = vsyncmov [#allocation3 + $0x5] }
  0xd2   :  { %s289_s1 = vpop.sfrf %288 }
  0xd3   :  { %p352_p0 = scmp.ne.s32.totalorder %s289_s1, 0 }
  0xd5   :  { %293 = shalt.err (%p352_p0)  }
  0xd6   :  { %295 = vsyncmov [#allocation3 + $0x6] }
  0xd9   :  { %s296_s2 = vpop.sfrf %295 }
  0xda   :  { %p353_p1 = scmp.ne.s32.totalorder %s296_s2, 0 }
  0xdc   :  { %300 = shalt.err (%p353_p1)  }
  0xdd   :  { %302 = vsyncmov [#allocation3 + $0x7] }
  0xe0   :  { %s303_s13 = vpop.sfrf %302 }
  0xe1   :  { %p354_p2 = scmp.ne.s32.totalorder %s303_s13, 0 }
  0xe3   :  { %307 = shalt.err (%p354_p2)  }

</bundles_post_ra>
